<compile_context>
chip_gen: v6e
topology: v6e:2x2x1
jax: 0.10.0
libtpu: 0.0.40
codegen_flags: <defaults>
</compile_context>

<pallas_src>
import jax
import jax.numpy as jnp
from jax.experimental import pallas as pl
from jax.experimental.pallas import tpu as pltpu


def _round_up(x, m):
    return ((x + m - 1) // m) * m


def _choose_tm(M, budget):
    """Pick the M-tile size (rows per grid step).

    Prefers (a) no pad rows (tm divides M, or tm == round_up(M, 8) when a
    single block suffices) and (b) >= 2 grid blocks when M is large enough so
    both v7x TensorCores get work, subject to the VMEM-derived `budget`.
    """
    budget = max(16, (budget // 8) * 8)
    if M <= budget:
        if M >= 1024:
            # Split into (at least) two blocks so a megacore chip isn't idle.
            return _round_up((M + 1) // 2, 8)
        return _round_up(M, 8)          # single block, at most 7 pad rows
    # Largest multiple-of-8 divisor of M not exceeding the budget -> Mp == M.
    for d in range(budget, 127, -8):
        if M % d == 0:
            return d
    return budget                        # padded fallback (rare)


def _derive_tiles(M, Kp, Ep, out_itemsize):
    """Derive (tm, te, Ep, vmem_limit) from this generation's VMEM capacity."""
    try:
        vmem_cap = int(pltpu.get_tpu_info().vmem_capacity_bytes)
    except Exception:
        vmem_cap = 64 << 20              # conservative default = v7x per-TC VMEM
    budget = int(vmem_cap * 0.55)

    # E tile: keep the whole projection weight resident (fetched exactly once)
    # whenever it fits; fall back to tiling E only for huge embed dims.
    if 2 * Kp * Ep * 2 <= budget // 2:
        te = Ep
    else:
        te = max(128, (((budget // 2) // (2 * Kp * 2)) // 128) * 128)
        te = min(te, Ep)
        Ep = _round_up(Ep, te)
    w_bytes = 2 * Kp * te * 2            # conservative: assume double-buffered

    # M tile: biggest double-buffered x/out tile that fits next to the weight.
    per_row = 2 * (Kp * 2 + te * out_itemsize)
    tm_budget = min(1024, max(16, (budget - w_bytes) // per_row))
    tm = _choose_tm(M, tm_budget)

    # VMEM limit: actual working set + headroom, capped at 75% of the chip.
    ws = 2 * (tm * Kp * 2 + tm * te * out_itemsize) + w_bytes + 2 * te * 4
    vmem_limit = int(min(int(vmem_cap * 0.75), max(32 << 20, ws + (8 << 20))))
    return tm, te, Ep, vmem_limit


def _patch_embed_kernel(x_ref, w_ref, b_ref, o_ref):
    # x_ref: (tm, Kp) bf16, w_ref: (Kp, te) bf16, b_ref: (1, te) f32,
    # o_ref: (tm, te) in the module's output dtype.
    # Full-K MXU matmul with f32 accumulation + fused bias add.
    acc = jnp.dot(x_ref[...], w_ref[...], preferred_element_type=jnp.float32)
    o_ref[...] = (acc + b_ref[...]).astype(o_ref.dtype)


def patch_embed(x, weight, bias, patch_size):
    """
    x:      (B, C, H, W)   NCHW, PyTorch convention
    weight: (E, C, ph, pw) Conv2d weight layout
    bias:   (E,)
    returns (B, num_patches, E) in x.dtype
    """
    B, C, H, W = x.shape
    E = weight.shape[0]
    ph, pw = patch_size
    if H % ph != 0 or W % pw != 0:
        raise ValueError(
            f"Image size ({H}, {W}) must be divisible by patch size ({ph}, {pw})."
        )
    gh, gw = H // ph, W // pw
    num_patches = gh * gw
    K = C * ph * pw
    M = B * num_patches
    out_dtype = x.dtype

    # --- glue: patch extraction --------------------------------------------
    # Cast to bf16 FIRST so the XLA transpose moves half the bytes (the cast
    # fuses into the transpose under jit).
    # TODO(synk): fuse this gather into the kernel via memory_space=pl.ANY +
    # manual make_async_copy to drop the extra HBM round trip of the image.
    xp = x.astype(jnp.bfloat16).reshape(B, C, gh, ph, gw, pw)
    xp = jnp.transpose(xp, (0, 2, 4, 1, 3, 5))        # (B, gh, gw, C, ph, pw)
    xm = xp.reshape(M, K)

    # Weight / bias prep (constant-folds under jit when weights are static):
    # (E, C, ph, pw) -> (K, E) bf16; bias -> (1, E) f32.
    wm = weight.astype(jnp.bfloat16).reshape(E, K).T
    bm = bias.astype(jnp.float32).reshape(1, E)

    Kp = _round_up(K, 128)
    Ep = _round_up(E, 128)
    tm, te, Ep, vmem_limit = _derive_tiles(M, Kp, Ep, jnp.dtype(out_dtype).itemsize)
    Mp = _round_up(M, tm)

    if Mp != M or Kp != K:
        xm = jnp.pad(xm, ((0, Mp - M), (0, Kp - K)))
    if Kp != K or Ep != E:
        wm = jnp.pad(wm, ((0, Kp - K), (0, Ep - E)))
    if Ep != E:
        bm = jnp.pad(bm, ((0, 0), (0, Ep - E)))

    # E is the OUTER grid axis (usually a single block), M the inner one, so
    # the weight / bias blocks are resident across the whole inner M sweep.
    grid = (Ep // te, Mp // tm)

    out = pl.pallas_call(
        _patch_embed_kernel,
        out_shape=jax.ShapeDtypeStruct((Mp, Ep), out_dtype),
        grid_spec=pltpu.PrefetchScalarGridSpec(
            num_scalar_prefetch=0,
            grid=grid,
            in_specs=[
                pl.BlockSpec((tm, Kp), lambda e, m: (m, 0)),   # patch rows
                pl.BlockSpec((Kp, te), lambda e, m: (0, e)),   # projection weight
                pl.BlockSpec((1, te), lambda e, m: (0, e)),    # bias (resident)
            ],
            out_specs=pl.BlockSpec((tm, te), lambda e, m: (m, e)),
        ),
        compiler_params=pltpu.CompilerParams(
            dimension_semantics=("parallel", "parallel"),
            vmem_limit_bytes=vmem_limit,
        ),
    )(xm, wm, bm)

    if Mp != M or Ep != E:
        out = out[:M, :E]
    return out.reshape(B, num_patches, E)


if __name__ == "__main__":
    # Small shapes consistent with the module: img_size=16, patch_size=8,
    # in_chans=4, embed_dim=128  ->  num_patches = 4, K = 4*8*8 = 256.
    B, C, H, W = 2, 4, 16, 16
    ph = pw = 8
    E = 128

    key = jax.random.PRNGKey(0)
    kx, kw, kb = jax.random.split(key, 3)
    x = jax.random.normal(kx, (B, C, H, W), dtype=jnp.float32)
    weight = jax.random.normal(kw, (E, C, ph, pw), dtype=jnp.float32) * 0.02
    bias = jax.random.normal(kb, (E,), dtype=jnp.float32) * 0.02

    fwd = jax.jit(patch_embed, static_argnames=("patch_size",))
    out = fwd(x, weight, bias, patch_size=(ph, pw))
    out = jax.block_until_ready(out)

    # Reference check against XLA conv (PyTorch Conv2d semantics, NCHW).
    # Tolerance loosened vs f32 because matmul inputs are bf16 (f32 accum).
    ref = jax.lax.conv_general_dilated(
        x, weight, window_strides=(ph, pw), padding="VALID",
        dimension_numbers=("NCHW", "OIHW", "NCHW"),
    ) + bias.reshape(1, E, 1, 1)
    ref = ref.reshape(B, E, -1).transpose(0, 2, 1)  # flatten(2).transpose(1, 2)

    assert out.shape == (B, (H // ph) * (W // pw), E)
    assert out.dtype == x.dtype
    assert jnp.allclose(out, ref, rtol=2e-2, atol=2e-2), (
        float(jnp.max(jnp.abs(out - ref)))
    )
    print("KERNEL_OK")
</pallas_src>

<mosaic_0001>
module attributes {stable_mosaic.version = 11 : i64} {
  func.func @_patch_embed_kernel(%arg0: i32, %arg1: i32, %arg2: memref<8x256xbf16, #tpu.memory_space<vmem>>, %arg3: memref<256x128xbf16, #tpu.memory_space<vmem>>, %arg4: memref<1x128xf32, #tpu.memory_space<vmem>>, %arg5: memref<8x128xf32, #tpu.memory_space<vmem>>) attributes {dimension_semantics = [#tpu.dimension_semantics<parallel>, #tpu.dimension_semantics<parallel>], iteration_bounds = array<i64: 1, 1>, scalar_prefetch = 0 : i64, scratch_operands = 0 : i64, tpu.core_type = #tpu.core_type<tc>, window_params = [{transform_indices = @transform_0, window_bounds = array<i64: 8, 256>}, {transform_indices = @transform_1, window_bounds = array<i64: 256, 128>}, {transform_indices = @transform_2, window_bounds = array<i64: 1, 128>}, {transform_indices = @transform_3, window_bounds = array<i64: 8, 128>}]} {
    %c0 = arith.constant 0 : index
    %c0_0 = arith.constant 0 : index
    %0 = vector.load %arg2[%c0, %c0_0] : memref<8x256xbf16, #tpu.memory_space<vmem>>, vector<8x256xbf16>
    %c0_1 = arith.constant 0 : index
    %c0_2 = arith.constant 0 : index
    %1 = vector.load %arg3[%c0_1, %c0_2] : memref<256x128xbf16, #tpu.memory_space<vmem>>, vector<256x128xbf16>
    %cst = arith.constant dense<0.000000e+00> : vector<8x128xf32>
    %2 = tpu.matmul %0, %1, %cst {dimension_numbers = #tpu.dot_dimension_numbers<[1], [0], [0], [1], [0, 0, 1, 1], [], []>} : vector<8x256xbf16>, vector<256x128xbf16>, vector<8x128xf32> -> vector<8x128xf32>
    %c0_3 = arith.constant 0 : index
    %c0_4 = arith.constant 0 : index
    %3 = vector.load %arg4[%c0_3, %c0_4] : memref<1x128xf32, #tpu.memory_space<vmem>>, vector<1x128xf32>
    %4 = vector.broadcast %3 : vector<1x128xf32> to vector<8x128xf32>
    %5 = arith.addf %2, %4 : vector<8x128xf32>
    %c0_5 = arith.constant 0 : index
    %c0_6 = arith.constant 0 : index
    %6 = vector.load %arg5[%c0_5, %c0_6] : memref<8x128xf32, #tpu.memory_space<vmem>>, vector<8x128xf32>
    tpu.vector_store %arg5[%c0_5, %c0_6], %5 {strides = array<i32>} : memref<8x128xf32, #tpu.memory_space<vmem>>, vector<8x128xf32>,
    return
  }
  func.func @transform_0(%arg0: i32, %arg1: i32) -> (i32, i32) {
    %c0_i32 = arith.constant 0 : i32
    %c0_i32_0 = arith.constant 0 : i32
    return %arg1, %c0_i32 : i32, i32
  }
  func.func @transform_1(%arg0: i32, %arg1: i32) -> (i32, i32) {
    %c0_i32 = arith.constant 0 : i32
    %c0_i32_0 = arith.constant 0 : i32
    return %c0_i32, %arg0 : i32, i32
  }
  func.func @transform_2(%arg0: i32, %arg1: i32) -> (i32, i32) {
    %c0_i32 = arith.constant 0 : i32
    %c0_i32_0 = arith.constant 0 : i32
    return %c0_i32, %arg0 : i32, i32
  }
  func.func @transform_3(%arg0: i32, %arg1: i32) -> (i32, i32) {
    %c0_i32 = arith.constant 0 : i32
    return %arg1, %arg0 : i32, i32
  }
}

</mosaic_0001>

<bundles_post_ra>
// kernel: patch_embed.1
= control target key start
LH: loop header
LB: loop body
LE: loop exit
PB: predicated region body
PF: predicated region fallthrough
CT: control target
= control target key end

     0   :  { %s374_s0 = inlined_call_operand.vmem [shape: bf16[8,256], index: 0, kind: input, shape index: {}]   ;;  %s375_s1 = inlined_call_operand.vmem [shape: bf16[256,128], index: 1, kind: input, shape index: {}]   ;;  %s376_s2 = inlined_call_operand.vmem [shape: f32[1,128], index: 2, kind: input, shape index: {}]   ;;  %s377_s3 = inlined_call_operand.hbm [shape: f32[8,128], index: 3, kind: output, shape index: {}]  }
   0x1   :  { %v256_v0 = vld [vmem:[%s375_s1 + $0x78] sm:$0xff]   ;;  %v258_v2 = vld [vmem:[%s375_s1 + $0x70] sm:$0xff]   ;;  %v260_v4 = vld [vmem:[%s375_s1 + $0x68] sm:$0xff]  }
   0x2   :  { %v257_v1 = vld [vmem:[%s375_s1 + $0x38] sm:$0xff]   ;;  %233 = vmatprep.subr.bf16.mxu0 %v256_v0  ;;  %v259_v3 = vld [vmem:[%s375_s1 + $0x30] sm:$0xff]   ;;  %v261_v5 = vld [vmem:[%s375_s1 + $0x28] sm:$0xff]  }
   0x3   :  { %234 = vmatpush3.bf16.msra.mxu0 %v257_v1  ;;  %v262_v6 = vld [vmem:[%s375_s1 + $0x60] sm:$0xff]   ;;  %v264_v8 = vld [vmem:[%s375_s1 + $0x58] sm:$0xff]   ;;  %v266_v10 = vld [vmem:[%s375_s1 + $0x50] sm:$0xff]  }
   0x4   :  { %235 = vmatprep.subr.bf16.mxu0 %v258_v2  ;;  %v263_v7 = vld [vmem:[%s375_s1 + $0x20] sm:$0xff]   ;;  %v265_v9 = vld [vmem:[%s375_s1 + $0x18] sm:$0xff]  }
   0x5   :  { %v16_v11 = vld [vmem:[%s374_s0] sm:$0xff] }
   0x7   :  { %236 = vmatpush3.bf16.msra.mxu0 %v259_v3 }
   0x8   :  { %237 = vmatprep.subr.bf16.mxu0 %v260_v4 }
   0xb   :  { %238 = vmatpush3.bf16.msra.mxu0 %v261_v5 }
   0xc   :  { %239 = vmatprep.subr.bf16.mxu0 %v262_v6 }
   0xf   :  { %240 = vmatpush3.bf16.msra.mxu0 %v263_v7 }
  0x10   :  { %241 = vmatprep.subr.bf16.mxu0 %v264_v8 }
  0x11   :  { %8 = vsyncpa [#allocation3], 0  ;;  %v216_v12 = vcombine.high %v16_v11, %v16_v11  ;;  %v267_v13 = vld [vmem:[%s375_s1 + $0x10] sm:$0xff]   ;;  %v268_v14 = vld [vmem:[%s375_s1 + $0x48] sm:$0xff]   ;;  %v215_v18 = vcombine.low %v16_v11, %v16_v11  ;;  %s296_s20 = smov [#allocation2]  }
  0x12   :  { %v269_v15 = vld [vmem:[%s375_s1 + $0x8] sm:$0xff]   ;;  %v270_v16 = vld [vmem:[%s375_s1 + $0x40] sm:$0xff]   ;;  %s206_s21 = sshll.u32 %s296_s20, 4  ;;  %s207_s21 = int_to_ptr.vmem [resolvable:$true] %s206_s21 }
  0x13   :  { %242 = vmatpush3.bf16.msra.mxu0 %v265_v9  ;;  %191 = vmatprep.mubr.bf16.mxu0 %v216_v12  ;;  %v271_v17 = vld [vmem:[%s375_s1] sm:$0xff]   ;;  %s274_s22 = scalar_lea.vmem %s207_s21, 128  ;;  %p279_p1 = scmp.lt.s32.totalorder %s207_s21, %s207_s21 }
  0x14   :  { %243 = vmatprep.subr.bf16.mxu0 %v266_v10  ;;  %v214_v21 = vld [vmem:[%s376_s2] ss:$0 sm:$0xff]  ;;  %p275_p0 = scmp.ne.s32.totalorder %s207_s21, %s274_s22  ;;  %p280_p2 = scmp.lt.s32.totalorder %s274_s22, %s274_s22 }
  0x16   :  { %p281_p3 = por %p280_p2, %p279_p1 }
  0x17   :  { %244 = vmatpush3.bf16.msra.mxu0 %v267_v13 }
  0x18   :  { %245 = vmatprep.subr.bf16.mxu0 %v268_v14  ;;  %p282_p4 = pnand %p281_p3, %p275_p0 }
  0x1b   :  { %246 = vmatpush3.bf16.msra.mxu0 %v269_v15 }
  0x1c   :  { %247 = vmatprep.subr.bf16.mxu0 %v270_v16 }
  0x1f   :  { %248 = vmatpush3.bf16.msra.mxu0 %v271_v17 }
  0x22   :  { %192 = vmatmul.mubr.bf16.vlgmr.msra.gmra.mxu0 %v215_v18 }
  0xe2   :  { %v249_v19 = vpop.f32.mrf.mxu0 }
  0xe4   :  { %v250_v20 = vpop.f32.mrf.mxu0 }
  0xe5   :  { %v251_v22 = vadd.f32 %v250_v20, %v249_v19 }
  0xe6   :  { %v252_v23 = vpop.f32.mrf.mxu0 }
  0xe7   :  { %v194_v24 = vadd.f32 %v251_v22, %v214_v21 }
  0xe8   :  { %v253_v25 = vpop.f32.mrf.mxu0 }
  0xe9   :  { %199 = vst [vmem:[#allocation2] sm:$0xff] %v194_v24 }
  0xea   :  { %285 = shalt.err (!%p282_p4)
}
  0xeb   :  { %209 = dma.vmem_to_hbm [thread:$0]  %s207_s21, 128, %s377_s3, [#allocation3]  }
  0xec   :  { %294 = dma.done.wait [#allocation3], 128  }
  0xed   :  { %295 = vsyncadd [#allocation3], 4294967168 }
  0xee   :  { %213 = vsyncpa [#allocation3], 1 }

</bundles_post_ra>
